<compile_context>
chip_gen: v7x
topology: tpu7x:2x2x1
jax: 0.10.0
libtpu: 0.0.40
codegen_flags: <defaults>
</compile_context>

<pallas_src>
import functools
import math

import jax
import jax.numpy as jnp
from jax import lax
from jax.experimental import pallas as pl
from jax.experimental.pallas import tpu as pltpu


FAVOR_EPS = 1e-4


# ------------------------------ helpers --------------------------------------

def _round_up(x, m):
    return ((x + m - 1) // m) * m


def _tile_and_pad(size, preferred, align):
    """Pick a tile <= preferred (aligned), and the padded extent divisible by it."""
    tile = min(preferred, _round_up(size, align))
    padded = _round_up(size, tile)
    return tile, padded


def _pad_axis(x, target, axis):
    pad = target - x.shape[axis]
    if pad == 0:
        return x
    widths = [(0, 0)] * x.ndim
    widths[axis] = (0, pad)
    return jnp.pad(x, widths)


def _apply_activation(acc, activation):
    if activation == "relu":
        return jnp.maximum(acc, 0.0)
    if activation == "gelu":
        return acc * 0.5 * (1.0 + lax.erf(acc / math.sqrt(2.0)))
    return acc


# ------------------- fused matmul + bias + activation kernel -----------------

def _matmul_bias_act_kernel(x_ref, w_ref, b_ref, o_ref, acc_ref, *, activation):
    k = pl.program_id(2)

    @pl.when(k == 0)
    def _():
        acc_ref[...] = jnp.zeros_like(acc_ref)

    acc_ref[...] += jnp.dot(x_ref[...], w_ref[...],
                            preferred_element_type=jnp.float32)

    @pl.when(k == pl.num_programs(2) - 1)
    def _():
        acc = acc_ref[...] + b_ref[...].astype(jnp.float32)
        acc = _apply_activation(acc, activation)
        o_ref[...] = acc.astype(o_ref.dtype)


def linear(x, w, b, *, activation=None, tm=256, tn=512, tk=512):
    """y = act(x @ w + b). x: (..., d_in), w: (d_in, d_out), b: (d_out,)."""
    orig_shape = x.shape
    d_in = orig_shape[-1]
    d_out = w.shape[1]
    x2 = x.reshape(-1, d_in)
    m = x2.shape[0]

    tm_, mp = _tile_and_pad(m, tm, 8)
    tn_, np_ = _tile_and_pad(d_out, tn, 128)
    tk_, kp = _tile_and_pad(d_in, tk, 128)

    x2 = _pad_axis(_pad_axis(x2, mp, 0), kp, 1)
    w2 = _pad_axis(_pad_axis(w, kp, 0), np_, 1)
    b2 = _pad_axis(b.reshape(1, d_out), np_, 1)

    out = pl.pallas_call(
        functools.partial(_matmul_bias_act_kernel, activation=activation),
        out_shape=jax.ShapeDtypeStruct((mp, np_), x.dtype),
        grid_spec=pltpu.PrefetchScalarGridSpec(
            num_scalar_prefetch=0,
            grid=(mp // tm_, np_ // tn_, kp // tk_),
            in_specs=[
                pl.BlockSpec((tm_, tk_), lambda i, j, k: (i, k)),
                pl.BlockSpec((tk_, tn_), lambda i, j, k: (k, j)),
                pl.BlockSpec((1, tn_), lambda i, j, k: (0, j)),
            ],
            out_specs=pl.BlockSpec((tm_, tn_), lambda i, j, k: (i, j)),
            scratch_shapes=[pltpu.VMEM((tm_, tn_), jnp.float32)],
        ),
        compiler_params=pltpu.CompilerParams(
            dimension_semantics=("parallel", "parallel", "arbitrary"),
            vmem_limit_bytes=64 * 1024 * 1024,
        ),
    )(x2, w2, b2)
    out = out[:m, :d_out]
    return out.reshape(orig_shape[:-1] + (d_out,))


# ----------- fused matmul + bias (+act) + residual add + LayerNorm -----------

def _linear_add_ln_kernel(x_ref, w_ref, b_ref, r_ref, g_ref, beta_ref,
                          o_ref, acc_ref, *, eps, activation):
    k = pl.program_id(1)

    @pl.when(k == 0)
    def _():
        acc_ref[...] = jnp.zeros_like(acc_ref)

    acc_ref[...] += jnp.dot(x_ref[...], w_ref[...],
                            preferred_element_type=jnp.float32)

    @pl.when(k == pl.num_programs(1) - 1)
    def _():
        y = acc_ref[...] + b_ref[...].astype(jnp.float32)
        y = _apply_activation(y, activation)
        s = y + r_ref[...].astype(jnp.float32)
        mean = jnp.mean(s, axis=-1, keepdims=True)
        c = s - mean
        var = jnp.mean(c * c, axis=-1, keepdims=True)      # biased var (torch default)
        inv = lax.rsqrt(var + eps)                         # EUP slot, ~free
        o_ref[...] = (c * inv * g_ref[...].astype(jnp.float32)
                      + beta_ref[...].astype(jnp.float32)).astype(o_ref.dtype)


def linear_add_layernorm(x, w, b, residual, gamma, beta, *,
                         activation=None, eps=1e-5, tm=256, tk=512):
    """LayerNorm(residual + act(x @ w + b)).  Output feature dim kept whole per block."""
    orig_shape = residual.shape
    d_in = x.shape[-1]
    d_out = w.shape[1]
    x2 = x.reshape(-1, d_in)
    r2 = residual.reshape(-1, d_out)
    m = x2.shape[0]

    tm_, mp = _tile_and_pad(m, tm, 8)
    tk_, kp = _tile_and_pad(d_in, tk, 128)

    x2 = _pad_axis(_pad_axis(x2, mp, 0), kp, 1)
    w2 = _pad_axis(w, kp, 0)
    r2 = _pad_axis(r2, mp, 0)
    b2 = b.reshape(1, d_out)
    g2 = gamma.reshape(1, d_out)
    be2 = beta.reshape(1, d_out)

    out = pl.pallas_call(
        functools.partial(_linear_add_ln_kernel, eps=eps, activation=activation),
        out_shape=jax.ShapeDtypeStruct((mp, d_out), residual.dtype),
        grid_spec=pltpu.PrefetchScalarGridSpec(
            num_scalar_prefetch=0,
            grid=(mp // tm_, kp // tk_),
            in_specs=[
                pl.BlockSpec((tm_, tk_), lambda i, k: (i, k)),
                pl.BlockSpec((tk_, d_out), lambda i, k: (k, 0)),
                pl.BlockSpec((1, d_out), lambda i, k: (0, 0)),
                pl.BlockSpec((tm_, d_out), lambda i, k: (i, 0)),
                pl.BlockSpec((1, d_out), lambda i, k: (0, 0)),
                pl.BlockSpec((1, d_out), lambda i, k: (0, 0)),
            ],
            out_specs=pl.BlockSpec((tm_, d_out), lambda i, k: (i, 0)),
            scratch_shapes=[pltpu.VMEM((tm_, d_out), jnp.float32)],
        ),
        compiler_params=pltpu.CompilerParams(
            dimension_semantics=("parallel", "arbitrary"),
            vmem_limit_bytes=64 * 1024 * 1024,
        ),
    )(x2, w2, b2, r2, g2, be2)
    return out[:m].reshape(orig_shape)


# --------------------------- FAVOR+ attention kernel -------------------------

def _favor_attention_kernel(q_ref, k_ref, v_ref, proj_ref, o_ref, *, eps):
    # q_ref: (1, Sq, Dh); k_ref, v_ref: (1, Skv, Dh); proj_ref: (Dh, M)
    q = q_ref[0].astype(jnp.float32)
    k = k_ref[0].astype(jnp.float32)
    v = v_ref[0].astype(jnp.float32)
    proj_t = proj_ref[...].astype(jnp.float32)

    dh = q.shape[-1]
    m = proj_t.shape[-1]
    data_normalizer = dh ** -0.25
    ratio = m ** -0.5

    qn = q * data_normalizer
    kn = k * data_normalizer
    q_dash = jnp.dot(qn, proj_t, preferred_element_type=jnp.float32)     # (Sq, M)
    k_dash = jnp.dot(kn, proj_t, preferred_element_type=jnp.float32)     # (Skv, M)
    q_diag = 0.5 * jnp.sum(qn * qn, axis=-1, keepdims=True)
    k_diag = 0.5 * jnp.sum(kn * kn, axis=-1, keepdims=True)

    q_max = jnp.max(q_dash, axis=-1, keepdims=True)                      # per query
    k_max = jnp.max(jnp.max(k_dash, axis=-1, keepdims=True),
                    axis=0, keepdims=True)                               # per head

    phi_q = ratio * (jnp.exp(q_dash - q_diag - q_max) + eps)
    phi_k = ratio * (jnp.exp(k_dash - k_diag - k_max) + eps)

    # Non-causal linear attention.
    k_sum = jnp.sum(phi_k, axis=0, keepdims=True)                        # (1, M)
    denom = jnp.sum(phi_q * k_sum, axis=-1, keepdims=True)               # (Sq, 1)
    context = lax.dot_general(phi_k, v, (((0,), (0,)), ((), ())),
                              preferred_element_type=jnp.float32)        # (M, Dh)
    out = jnp.dot(phi_q, context, preferred_element_type=jnp.float32)    # (Sq, Dh)
    o_ref[0] = (out * pl.reciprocal(denom, approx=True)).astype(o_ref.dtype)


def favor_attention(q, k, v, proj_t, *, eps=FAVOR_EPS):
    """q: (BH, Sq, Dh); k, v: (BH, Skv, Dh); proj_t: (Dh, M)."""
    bh, sq, dh = q.shape
    skv = k.shape[1]
    nb_features = proj_t.shape[1]
    return pl.pallas_call(
        functools.partial(_favor_attention_kernel, eps=eps),
        out_shape=jax.ShapeDtypeStruct((bh, sq, dh), q.dtype),
        grid_spec=pltpu.PrefetchScalarGridSpec(
            num_scalar_prefetch=0,
            grid=(bh,),
            in_specs=[
                pl.BlockSpec((1, sq, dh), lambda i: (i, 0, 0)),
                pl.BlockSpec((1, skv, dh), lambda i: (i, 0, 0)),
                pl.BlockSpec((1, skv, dh), lambda i: (i, 0, 0)),
                pl.BlockSpec((dh, nb_features), lambda i: (0, 0)),
            ],
            out_specs=pl.BlockSpec((1, sq, dh), lambda i: (i, 0, 0)),
        ),
        compiler_params=pltpu.CompilerParams(
            dimension_semantics=("parallel",)),
    )(q, k, v, proj_t)


# ----------------------------- Performer attention ---------------------------

class PerformerAttention:
    """FAVOR+ (softmax random-feature) multi-head attention, non-causal."""

    def __init__(self, dim, heads, key, nb_features=None, dtype=jnp.float32):
        assert dim % heads == 0
        self.dim = dim
        self.heads = heads
        self.dim_head = dim // heads
        self.nb_features = nb_features or 2 * self.dim_head
        ks = jax.random.split(key, 9)

        def lin(kw, kb, d_in, d_out):
            w = jax.random.normal(kw, (d_in, d_out), dtype) * (1.0 / math.sqrt(d_in))
            b = jax.random.normal(kb, (d_out,), dtype) * 0.01
            return w, b

        self.wq, self.bq = lin(ks[0], ks[1], dim, dim)
        self.wk, self.bk = lin(ks[2], ks[3], dim, dim)
        self.wv, self.bv = lin(ks[4], ks[5], dim, dim)
        self.wo, self.bo = lin(ks[6], ks[7], dim, dim)
        # Fused projection weights (single matmul per source tensor).
        self.w_qkv = jnp.concatenate([self.wq, self.wk, self.wv], axis=1)
        self.b_qkv = jnp.concatenate([self.bq, self.bk, self.bv])
        self.w_kv = jnp.concatenate([self.wk, self.wv], axis=1)
        self.b_kv = jnp.concatenate([self.bk, self.bv])
        # TODO(synk): performer-pytorch uses orthogonal Gaussian features; plain Gaussian used here.
        self.proj_t = jax.random.normal(
            ks[8], (self.dim_head, self.nb_features), dtype)  # (Dh, M), pre-transposed

    def _split_heads(self, x):
        b, s, _ = x.shape
        x = x.reshape(b, s, self.heads, self.dim_head).transpose(0, 2, 1, 3)
        return x.reshape(b * self.heads, s, self.dim_head)

    def _merge_heads(self, x, b, s):
        x = x.reshape(b, self.heads, s, self.dim_head).transpose(0, 2, 1, 3)
        return x.reshape(b, s, self.dim)

    def core(self, x, context=None):
        """Multi-head FAVOR+ attention up to (but excluding) the output projection."""
        self_attn = context is None
        context = x if self_attn else context
        b, sq, _ = x.shape
        if self_attn:
            qkv = linear(x, self.w_qkv, self.b_qkv)
            q, k, v = jnp.split(qkv, 3, axis=-1)
        else:
            q = linear(x, self.wq, self.bq)
            kv = linear(context, self.w_kv, self.b_kv)
            k, v = jnp.split(kv, 2, axis=-1)
        oh = favor_attention(self._split_heads(q), self._split_heads(k),
                             self._split_heads(v), self.proj_t)
        return self._merge_heads(oh, b, sq)

    def __call__(self, x, context=None):
        o = self.core(x, context)
        return linear(o, self.wo, self.bo)


# --------------------------- decoder layer (forward) -------------------------

class TransformerPerformerDecoderLayerPallas:
    """Pallas forward pass of TransformerPerformerDecoderLayer (inference)."""

    def __init__(self, d_model, nhead, dim_feedforward=2048, dropout=0.1,
                 activation="relu", key=None):
        key = key if key is not None else jax.random.PRNGKey(0)
        k_self, k_cross, k1w, k1b, k2w, k2b = jax.random.split(key, 6)
        self.attn = PerformerAttention(d_model, nhead, k_self)
        self.multihead_attn = PerformerAttention(d_model, nhead, k_cross)
        self.w1 = jax.random.normal(k1w, (d_model, dim_feedforward), jnp.float32) \
            * (1.0 / math.sqrt(d_model))
        self.b1 = jax.random.normal(k1b, (dim_feedforward,), jnp.float32) * 0.01
        self.w2 = jax.random.normal(k2w, (dim_feedforward, d_model), jnp.float32) \
            * (1.0 / math.sqrt(dim_feedforward))
        self.b2 = jax.random.normal(k2b, (d_model,), jnp.float32) * 0.01
        # LayerNorm default init (weight=1, bias=0, eps=1e-5).
        self.g1 = jnp.ones((d_model,), jnp.float32)
        self.beta1 = jnp.zeros((d_model,), jnp.float32)
        self.g2 = jnp.ones((d_model,), jnp.float32)
        self.beta2 = jnp.zeros((d_model,), jnp.float32)
        self.g3 = jnp.ones((d_model,), jnp.float32)
        self.beta3 = jnp.zeros((d_model,), jnp.float32)
        self.eps = 1e-5
        self.activation = activation
        # TODO(synk): dropout layers are identity at inference time; p is ignored here.

    def __call__(self, tgt, memory):
        # tgt: (T, B, d_model), memory: (S, B, d_model) — same layout as the torch module.
        tgt_bf = jnp.transpose(tgt, (1, 0, 2))
        mem_bf = jnp.transpose(memory, (1, 0, 2))

        # --- self-attention block: out-proj + residual add + LN fused ----------
        o = self.attn.core(tgt_bf)
        x = linear_add_layernorm(o, self.attn.wo, self.attn.bo,
                                 tgt_bf, self.g1, self.beta1, eps=self.eps)

        # --- cross-attention block ---------------------------------------------
        o = self.multihead_attn.core(x, context=mem_bf)
        x = linear_add_layernorm(o, self.multihead_attn.wo, self.multihead_attn.bo,
                                 x, self.g2, self.beta2, eps=self.eps)

        # --- feed-forward block (act fused into linear1; linear2+add+LN fused) --
        h = linear(x, self.w1, self.b1, activation=self.activation)
        x = linear_add_layernorm(h, self.w2, self.b2,
                                 x, self.g3, self.beta3, eps=self.eps)

        return jnp.transpose(x, (1, 0, 2))


# ------------------------------ pure-JAX reference ---------------------------

def _reference_forward(layer, tgt, memory):
    def ln(x, g, b, eps):
        mu = jnp.mean(x, -1, keepdims=True)
        var = jnp.mean((x - mu) ** 2, -1, keepdims=True)
        return (x - mu) / jnp.sqrt(var + eps) * g + b

    def favor_ref(q, k, v, proj_t, eps=FAVOR_EPS):
        dh = q.shape[-1]
        m = proj_t.shape[-1]
        dn = dh ** -0.25
        ratio = m ** -0.5
        qn = q * dn
        kn = k * dn
        qd = jnp.einsum("bsd,dm->bsm", qn, proj_t)
        kd = jnp.einsum("bsd,dm->bsm", kn, proj_t)
        qdiag = 0.5 * jnp.sum(qn * qn, -1, keepdims=True)
        kdiag = 0.5 * jnp.sum(kn * kn, -1, keepdims=True)
        qmax = jnp.max(qd, -1, keepdims=True)
        kmax = jnp.max(kd, axis=(1, 2), keepdims=True)
        phi_q = ratio * (jnp.exp(qd - qdiag - qmax) + eps)
        phi_k = ratio * (jnp.exp(kd - kdiag - kmax) + eps)
        k_sum = jnp.sum(phi_k, axis=1)
        denom = jnp.einsum("bsm,bm->bs", phi_q, k_sum)[..., None]
        ctx = jnp.einsum("bsm,bsd->bmd", phi_k, v)
        return jnp.einsum("bsm,bmd->bsd", phi_q, ctx) / denom

    def attn_ref(mod, x, context=None):
        context = x if context is None else context
        b, sq, _ = x.shape
        q = x @ mod.wq + mod.bq
        k = context @ mod.wk + mod.bk
        v = context @ mod.wv + mod.bv

        def split(t):
            bb, ss, _ = t.shape
            return t.reshape(bb, ss, mod.heads, mod.dim_head) \
                    .transpose(0, 2, 1, 3).reshape(bb * mod.heads, ss, mod.dim_head)

        oh = favor_ref(split(q), split(k), split(v), mod.proj_t)
        o = oh.reshape(b, mod.heads, sq, mod.dim_head) \
              .transpose(0, 2, 1, 3).reshape(b, sq, mod.dim)
        return o @ mod.wo + mod.bo

    tgt_bf = jnp.transpose(tgt, (1, 0, 2))
    mem_bf = jnp.transpose(memory, (1, 0, 2))
    t2 = attn_ref(layer.attn, tgt_bf)
    x = ln(tgt_bf + t2, layer.g1, layer.beta1, layer.eps)
    t2 = attn_ref(layer.multihead_attn, x, mem_bf)
    x = ln(x + t2, layer.g2, layer.beta2, layer.eps)
    h = x @ layer.w1 + layer.b1
    if layer.activation == "relu":
        h = jnp.maximum(h, 0.0)
    else:
        h = h * 0.5 * (1.0 + lax.erf(h / math.sqrt(2.0)))
    t2 = h @ layer.w2 + layer.b2
    x = ln(x + t2, layer.g3, layer.beta3, layer.eps)
    return jnp.transpose(x, (1, 0, 2))


# ----------------------------------- demo ------------------------------------

if __name__ == "__main__":
    d_model, nhead, dim_ff = 128, 4, 256
    tgt_len, mem_len, batch = 16, 24, 2

    key = jax.random.PRNGKey(0)
    k_tgt, k_mem, k_params = jax.random.split(key, 3)
    tgt = jax.random.normal(k_tgt, (tgt_len, batch, d_model), jnp.float32)
    memory = jax.random.normal(k_mem, (mem_len, batch, d_model), jnp.float32)

    layer = TransformerPerformerDecoderLayerPallas(
        d_model, nhead, dim_feedforward=dim_ff, activation="relu", key=k_params)

    out = layer(tgt, memory)
    out = jax.block_until_ready(out)
    assert out.shape == (tgt_len, batch, d_model)

    ref = _reference_forward(layer, tgt, memory)
    assert jnp.allclose(out, ref, atol=5e-2, rtol=5e-2), \
        f"mismatch vs reference, max abs err {jnp.max(jnp.abs(out - ref))}"

    print("KERNEL_OK")
</pallas_src>

<mosaic_0001>
module attributes {stable_mosaic.version = 11 : i64} {
  func.func @_matmul_bias_act_kernel(%arg0: i32, %arg1: i32, %arg2: i32, %arg3: memref<32x128xf32, #tpu.memory_space<vmem>>, %arg4: memref<128x384xf32, #tpu.memory_space<vmem>>, %arg5: memref<1x384xf32, #tpu.memory_space<vmem>>, %arg6: memref<32x384xf32, #tpu.memory_space<vmem>>, %arg7: memref<32x384xf32, #tpu.memory_space<vmem>>) attributes {dimension_semantics = [#tpu.dimension_semantics<parallel>, #tpu.dimension_semantics<parallel>, #tpu.dimension_semantics<arbitrary>], iteration_bounds = array<i64: 1, 1, 1>, scalar_prefetch = 0 : i64, scratch_operands = 1 : i64, tpu.core_type = #tpu.core_type<tc>, window_params = [{transform_indices = @transform_0, window_bounds = array<i64: 32, 128>}, {transform_indices = @transform_1, window_bounds = array<i64: 128, 384>}, {transform_indices = @transform_2, window_bounds = array<i64: 1, 384>}, {transform_indices = @transform_3, window_bounds = array<i64: 32, 384>}]} {
    %c0_i32 = arith.constant 0 : i32
    %0 = arith.cmpi eq, %arg2, %c0_i32 : i32
    %1 = arith.extui %0 : i1 to i32
    %c0_i32_0 = arith.constant 0 : i32
    %2 = arith.cmpi ne, %1, %c0_i32_0 : i32
    scf.if %2 {
      %cst_10 = arith.constant 0.000000e+00 : f32
      %12 = vector.broadcast %cst_10 : f32 to vector<32x384xf32>
      %c0_11 = arith.constant 0 : index
      %c0_12 = arith.constant 0 : index
      %13 = vector.load %arg7[%c0_11, %c0_12] : memref<32x384xf32, #tpu.memory_space<vmem>>, vector<32x384xf32>
      tpu.vector_store %arg7[%c0_11, %c0_12], %12 {strides = array<i32>} : memref<32x384xf32, #tpu.memory_space<vmem>>, vector<32x384xf32>,
    } else {
    }
    %c0 = arith.constant 0 : index
    %c0_1 = arith.constant 0 : index
    %3 = vector.load %arg7[%c0, %c0_1] : memref<32x384xf32, #tpu.memory_space<vmem>>, vector<32x384xf32>
    %c0_2 = arith.constant 0 : index
    %c0_3 = arith.constant 0 : index
    %4 = vector.load %arg3[%c0_2, %c0_3] : memref<32x128xf32, #tpu.memory_space<vmem>>, vector<32x128xf32>
    %c0_4 = arith.constant 0 : index
    %c0_5 = arith.constant 0 : index
    %5 = vector.load %arg4[%c0_4, %c0_5] : memref<128x384xf32, #tpu.memory_space<vmem>>, vector<128x384xf32>
    %cst = arith.constant dense<0.000000e+00> : vector<32x384xf32>
    %6 = tpu.matmul %4, %5, %cst {dimension_numbers = #tpu.dot_dimension_numbers<[1], [0], [0], [1], [0, 0, 1, 1], [], []>} : vector<32x128xf32>, vector<128x384xf32>, vector<32x384xf32> -> vector<32x384xf32>
    %7 = arith.addf %3, %6 : vector<32x384xf32>
    %c0_6 = arith.constant 0 : index
    %c0_7 = arith.constant 0 : index
    %8 = vector.load %arg7[%c0_6, %c0_7] : memref<32x384xf32, #tpu.memory_space<vmem>>, vector<32x384xf32>
    tpu.vector_store %arg7[%c0_6, %c0_7], %7 {strides = array<i32>} : memref<32x384xf32, #tpu.memory_space<vmem>>, vector<32x384xf32>,
    %c0_i32_8 = arith.constant 0 : i32
    %9 = arith.cmpi eq, %arg2, %c0_i32_8 : i32
    %10 = arith.extui %9 : i1 to i32
    %c0_i32_9 = arith.constant 0 : i32
    %11 = arith.cmpi ne, %10, %c0_i32_9 : i32
    scf.if %11 {
      %c0_10 = arith.constant 0 : index
      %c0_11 = arith.constant 0 : index
      %12 = vector.load %arg7[%c0_10, %c0_11] : memref<32x384xf32, #tpu.memory_space<vmem>>, vector<32x384xf32>
      %c0_12 = arith.constant 0 : index
      %c0_13 = arith.constant 0 : index
      %13 = vector.load %arg5[%c0_12, %c0_13] : memref<1x384xf32, #tpu.memory_space<vmem>>, vector<1x384xf32>
      %14 = vector.broadcast %13 : vector<1x384xf32> to vector<32x384xf32>
      %15 = arith.addf %12, %14 : vector<32x384xf32>
      %c0_14 = arith.constant 0 : index
      %c0_15 = arith.constant 0 : index
      %16 = vector.load %arg6[%c0_14, %c0_15] : memref<32x384xf32, #tpu.memory_space<vmem>>, vector<32x384xf32>
      tpu.vector_store %arg6[%c0_14, %c0_15], %15 {strides = array<i32>} : memref<32x384xf32, #tpu.memory_space<vmem>>, vector<32x384xf32>,
    } else {
    }
    return
  }
  func.func @transform_0(%arg0: i32, %arg1: i32, %arg2: i32) -> (i32, i32) {
    %c0_i32 = arith.constant 0 : i32
    return %arg0, %arg2 : i32, i32
  }
  func.func @transform_1(%arg0: i32, %arg1: i32, %arg2: i32) -> (i32, i32) {
    %c0_i32 = arith.constant 0 : i32
    return %arg2, %arg1 : i32, i32
  }
  func.func @transform_2(%arg0: i32, %arg1: i32, %arg2: i32) -> (i32, i32) {
    %c0_i32 = arith.constant 0 : i32
    %c0_i32_0 = arith.constant 0 : i32
    return %c0_i32, %arg1 : i32, i32
  }
  func.func @transform_3(%arg0: i32, %arg1: i32, %arg2: i32) -> (i32, i32) {
    %c0_i32 = arith.constant 0 : i32
    return %arg0, %arg1 : i32, i32
  }
}

</mosaic_0001>

<bundles_post_ra>
// kernel: tpu_custom_call.1
= control target key start
LH: loop header
LB: loop body
LE: loop exit
PB: predicated region body
PF: predicated region fallthrough
CT: control target
= control target key end

     0   :  { %8 = vsyncpa [#allocation4], 0  ;;  %s718_s0 = inlined_call_operand.hbm [shape: f32[32,128], index: 0, kind: input, shape index: {}]   ;;  %s719_s1 = inlined_call_operand.hbm [shape: f32[128,384], index: 1, kind: input, shape index: {}]   ;;  %s720_s2 = inlined_call_operand.hbm [shape: f32[1,384], index: 2, kind: input, shape index: {}]   ;;  %s721_s3 = inlined_call_operand.hbm [shape: f32[32,384], index: 3, kind: output, shape index: {}]  }
   0x1   :  { %9 = vsyncpa [#allocation7], 0 }
   0x2   :  { %10 = vsyncpa [#allocation5], 0  ;;  %s631_s12 = smov [#allocation6]   ;;  %s537_s16 = scalar_lea.hbm %s719_s1, 6144 }
   0x3   :  { %s28_s13 = sshll.u32 %s631_s12, 4  ;;  %p538_p0 = scmp.ne.s32.totalorder %s719_s1, %s537_s16  ;;  %s29_s13 = int_to_ptr.vmem [resolvable:$true] %s28_s13 }
   0x4   :  { %p541_p1 = scmp.lt.u32.totalorder %s537_s16, %s719_s1 }
   0x6   :  { %p543_p2 = pnand %p541_p1, %p538_p0 }
   0x8   :  { %546 = shalt.err (!%p543_p2)
}
   0x9   :  { %s547_s21 = scalar_lea.vmem %s29_s13, 6144  ;;  %p552_p4 = scmp.lt.s32.totalorder %s29_s13, %s29_s13 }
   0xa   :  { %p548_p3 = scmp.ne.s32.totalorder %s29_s13, %s547_s21  ;;  %p553_p5 = scmp.lt.s32.totalorder %s547_s21, %s547_s21 }
   0xc   :  { %p554_p6 = por %p553_p5, %p552_p4 }
   0xe   :  { %p555_p7 = pnand %p554_p6, %p548_p3 }
  0x10   :  { %558 = shalt.err (!%p555_p7)
}
  0x11   :  { %s632_s22 = smov 384   ;;  %s633_s23 = smov 24  }
  0x12   :  { %34 = dma.hbm_to_vmem [thread:$0]  %s719_s1, 6144, %s29_s13, [#allocation7], %s632_s22, %s632_s22, %s633_s23  }
  0x13   :  { %s634_s26 = smov [#allocation3]   ;;  %s559_s30 = scalar_lea.hbm %s718_s0, 512 }
  0x14   :  { %s16_s27 = sshll.u32 %s634_s26, 4  ;;  %p560_p8 = scmp.ne.s32.totalorder %s718_s0, %s559_s30  ;;  %s17_s27 = int_to_ptr.vmem [resolvable:$true] %s16_s27 }
  0x15   :  { %p563_p9 = scmp.lt.u32.totalorder %s559_s30, %s718_s0 }
  0x17   :  { %p565_p10 = pnand %p563_p9, %p560_p8 }
  0x19   :  { %568 = shalt.err (!%p565_p10)
}
  0x1a   :  { %s569_s8 = scalar_lea.vmem %s17_s27, 512  ;;  %p574_p12 = scmp.lt.s32.totalorder %s17_s27, %s17_s27 }
  0x1b   :  { %p570_p11 = scmp.ne.s32.totalorder %s17_s27, %s569_s8  ;;  %p575_p13 = scmp.lt.s32.totalorder %s569_s8, %s569_s8 }
  0x1d   :  { %p576_p0 = por %p575_p13, %p574_p12 }
  0x1f   :  { %p577_p1 = pnand %p576_p0, %p570_p11 }
  0x21   :  { %580 = shalt.err (!%p577_p1)
}
  0x22   :  { %s635_s1 = smov 128   ;;  %s636_s9 = smov 8  }
  0x23   :  { %22 = dma.hbm_to_vmem [thread:$0]  %s718_s0, 512, %s17_s27, [#allocation4], %s635_s1, %s635_s1, %s636_s9  }
  0x24   :  { %s637_s12 = smov [#allocation8]   ;;  %s581_s16 = scalar_lea.hbm %s720_s2, 48 }
  0x25   :  { %s41_s13 = sshll.u32 %s637_s12, 4  ;;  %p582_p2 = scmp.ne.s32.totalorder %s720_s2, %s581_s16  ;;  %s42_s13 = int_to_ptr.vmem [resolvable:$true] %s41_s13 }
  0x26   :  { %p585_p3 = scmp.lt.u32.totalorder %s581_s16, %s720_s2 }
  0x28   :  { %p587_p4 = pnand %p585_p3, %p582_p2 }
  0x2a   :  { %590 = shalt.err (!%p587_p4)
}
  0x2b   :  { %s591_s21 = scalar_lea.vmem %s42_s13, 48  ;;  %s595_s0 = scalar_lea.vmem %s42_s13, 64 }
  0x2c   :  { %p592_p5 = scmp.ne.s32.totalorder %s42_s13, %s591_s21  ;;  %p596_p6 = scmp.lt.s32.totalorder %s42_s13, %s42_s13 }
  0x2d   :  { %p597_p7 = scmp.lt.s32.totalorder %s595_s0, %s591_s21 }
  0x2f   :  { %p598_p8 = por %p597_p7, %p596_p6 }
  0x31   :  { %p599_p9 = pnand %p598_p8, %p592_p5 }
  0x33   :  { %602 = shalt.err (!%p599_p9)
}
  0x34   :  { %44 = dma.hbm_to_vmem [thread:$0]  %s720_s2, 48, %s42_s13, [#allocation7]  }
  0x35   :  { %625 = dma.done.wait [#allocation4], 512  }
  0x36   :  { %626 = vsyncadd [#allocation4], 4294966784 }
  0x37   :  { %627 = dma.done.wait [#allocation7], 6192  }
  0x38   :  { %628 = vsyncadd [#allocation7], 4294961104  ;;  %v638_v0 = vmov 0.0   ;;  %v87_v1 = vld [vmem:[#allocation6 + $0x8] sm:$0xff]  ;;  %v90_v2 = vld [vmem:[#allocation6 + $0x20] sm:$0xff]  ;;  %s639_s2 = smov [#allocation9]  }
  0x39   :  { %198 = vmatprep.mubr.f32.mxu0 %v638_v0  ;;  %v86_v3 = vld [vmem:[#allocation6] sm:$0xff]  ;;  %v464_v4 = vpack.c.bf16 %v90_v2, %v87_v1  ;;  %v89_v5 = vld [vmem:[#allocation6 + $0x18] sm:$0xff]  ;;  %v96_v7 = vld [vmem:[#allocation6 + $0x50] sm:$0xff]  ;;  %s393_s26 = sshll.u32 %s639_s2, 4  ;;  %s394_s26 = int_to_ptr.vmem [resolvable:$true] %s393_s26 }
  0x3a   :  { %v93_v6 = vld [vmem:[#allocation6 + $0x38] sm:$0xff]  ;;  %v466_v8 = vpack.c.bf16 %v89_v5, %v86_v3  ;;  %v92_v10 = vld [vmem:[#allocation6 + $0x30] sm:$0xff]  ;;  %v95_v11 = vld [vmem:[#allocation6 + $0x48] sm:$0xff]  ;;  %s603_s27 = scalar_lea.vmem %s394_s26, 1536  ;;  %p608_p11 = scmp.lt.s32.totalorder %s394_s26, %s394_s26 }
  0x3b   :  { %v468_v9 = vpack.c.bf16 %v96_v7, %v93_v6  ;;  %v88_v12 = vld [vmem:[#allocation6 + $0x10] sm:$0xff]  ;;  %465 = vmatprep.subr.bf16.mxu0 %v464_v4  ;;  %v91_v13 = vld [vmem:[#allocation6 + $0x28] sm:$0xff]  ;;  %v102_v15 = vld [vmem:[#allocation6 + $0x80] sm:$0xff]  ;;  %v470_v16 = vpack.c.bf16 %v95_v11, %v92_v10  ;;  %p604_p10 = scmp.ne.s32.totalorder %s394_s26, %s603_s27  ;;  %p609_p12 = scmp.lt.s32.totalorder %s603_s27, %s603_s27 }
  0x3c   :  { %v99_v14 = vld [vmem:[#allocation6 + $0x68] sm:$0xff]  ;;  %467 = vmatpush1.bf16.msra.mxu0 %v466_v8  ;;  %v496_v17 = vpack.c.bf16 %v91_v13, %v88_v12  ;;  %v94_v18 = vld [vmem:[#allocation6 + $0x40] sm:$0xff]  ;;  %v101_v21 = vld [vmem:[#allocation6 + $0x78] sm:$0xff] }
  0x3d   :  { %469 = vmatprep.subr.bf16.mxu0 %v468_v9  ;;  %v472_v19 = vpack.c.bf16 %v102_v15, %v99_v14  ;;  %v98_v20 = vld [vmem:[#allocation6 + $0x60] sm:$0xff]  ;;  %v97_v22 = vld [vmem:[#allocation6 + $0x58] sm:$0xff]  ;;  %v108_v25 = vld [vmem:[#allocation6 + $0xb0] sm:$0xff]  ;;  %v349_v14 = vlaneseq  ;;  %p610_p13 = por %p609_p12, %p608_p11 }
  0x3e   :  { %497 = vmatprep.subr.bf16.mxu1 %v496_v17  ;;  %v500_v23 = vpack.c.bf16 %v97_v22, %v94_v18  ;;  %v105_v24 = vld [vmem:[#allocation6 + $0x98] sm:$0xff]  ;;  %v100_v26 = vld [vmem:[#allocation6 + $0x70] sm:$0xff]  ;;  %v103_v27 = vld [vmem:[#allocation6 + $0x88] sm:$0xff]  ;;  %v474_v28 = vpack.c.bf16 %v101_v21, %v98_v20 }
  0x3f   :  { %499 = vmatpush3.bf16.msra.mxu1 %v496_v17  ;;  %v104_v29 = vld [vmem:[#allocation6 + $0x90] sm:$0xff]  ;;  %v504_v30 = vpack.c.bf16 %v103_v27, %v100_v26  ;;  %v476_v31 = vpack.c.bf16 %v108_v25, %v105_v24  ;;  %v107_v32 = vld [vmem:[#allocation6 + $0xa8] sm:$0xff]  ;;  %v106_v33 = vld [vmem:[#allocation6 + $0xa0] sm:$0xff]  ;;  %v350_v15 = vshrl.u32 %v349_v14, 7  ;;  %p611_p0 = pnand %p610_p13, %p604_p10 }
  0x40   :  { %471 = vmatpush1.bf16.msra.mxu0 %v470_v16  ;;  %501 = vmatprep.subr.bf16.mxu1 %v500_v23  ;;  %v109_v34 = vld [vmem:[#allocation6 + $0xb8] sm:$0xff]  ;;  %v111_v35 = vld [vmem:[#allocation6 + $0xc8] sm:$0xff]  ;;  %v114_v36 = vld [vmem:[#allocation6 + $0xe0] sm:$0xff]  ;;  %v478_v37 = vpack.c.bf16 %v107_v32, %v104_v29 }
  0x41   :  { %473 = vmatprep.subr.bf16.mxu0 %v472_v19  ;;  %v110_v38 = vld [vmem:[#allocation6 + $0xc0] sm:$0xff]  ;;  %v508_v39 = vpack.c.bf16 %v109_v34, %v106_v33  ;;  %v480_v40 = vpack.c.bf16 %v114_v36, %v111_v35  ;;  %v113_v41 = vld [vmem:[#allocation6 + $0xd8] sm:$0xff]  ;;  %v112_v42 = vld [vmem:[#allocation6 + $0xd0] sm:$0xff]  ;;  %v351_v16 = vsub.s32 0, %v350_v15  ;;  %v355_v18 = vsub.s32 1, %v350_v15 }
  0x42   :  { %v115_v43 = vld [vmem:[#allocation6 + $0xe8] sm:$0xff]  ;;  %v117_v44 = vld [vmem:[#allocation6 + $0xf8] sm:$0xff]  ;;  %v120_v45 = vld [vmem:[#allocation6 + $0x110] sm:$0xff]  ;;  %v482_v46 = vpack.c.bf16 %v113_v41, %v110_v38  ;;  %v359_v19 = vsub.s32 2, %v350_v15 }
  0x43   :  { %503 = vmatpush3.bf16.msra.mxu1 %v500_v23  ;;  %v116_v47 = vld [vmem:[#allocation6 + $0xf0] sm:$0xff]  ;;  %v512_v48 = vpack.c.bf16 %v115_v43, %v112_v42  ;;  %v82_v49 = vld [vmem:[#allocation3] sm:$0xff]  ;;  %v484_v50 = vpack.c.bf16 %v120_v45, %v117_v44  ;;  %v119_v51 = vld [vmem:[#allocation6 + $0x108] sm:$0xff] }
  0x44   :  { %475 = vmatpush1.bf16.msra.mxu0 %v474_v28  ;;  %505 = vmatprep.subr.bf16.mxu1 %v504_v30  ;;  %v118_v52 = vld [vmem:[#allocation6 + $0x100] sm:$0xff]  ;;  %v121_v53 = vld [vmem:[#allocation6 + $0x118] sm:$0xff]  ;;  %v123_v54 = vld [vmem:[#allocation6 + $0x128] sm:$0xff]  ;;  %v486_v56 = vpack.c.bf16 %v119_v51, %v116_v47 }
  0x45   :  { %477 = vmatprep.subr.bf16.mxu0 %v476_v31  ;;  %458 = vmatprep.mubr.f32.mxu1 %v82_v49  ;;  %v126_v55 = vld [vmem:[#allocation6 + $0x140] sm:$0xff]  ;;  %v516_v58 = vpack.c.bf16 %v121_v53, %v118_v52  ;;  %v125_v60 = vld [vmem:[#allocation6 + $0x138] sm:$0xff]  ;;  %v124_v61 = vld [vmem:[#allocation6 + $0x130] sm:$0xff] }
  0x46   :  { %v122_v57 = vld [vmem:[#allocation6 + $0x120] sm:$0xff]  ;;  %v488_v59 = vpack.c.bf16 %v126_v55, %v123_v54  ;;  %v127_v62 = vld [vmem:[#allocation6 + $0x148] sm:$0xff]  ;;  %v129_v63 = vld [vmem:[#allocation6 + $0x158] sm:$0xff] }
  0x47   :  { %507 = vmatpush3.bf16.msra.mxu1 %v504_v30  ;;  %v132_v1 = vld [vmem:[#allocation6 + $0x170] sm:$0xff]  ;;  %v490_v2 = vpack.c.bf16 %v125_v60, %v122_v57  ;;  %v520_v4 = vpack.c.bf16 %v127_v62, %v124_v61  ;;  %v131_v6 = vld [vmem:[#allocation6 + $0x168] sm:$0xff]  ;;  %v130_v7 = vld [vmem:[#allocation6 + $0x160] sm:$0xff] }
  0x48   :  { %479 = vmatpush1.bf16.msra.mxu0 %v478_v37  ;;  %509 = vmatprep.subr.bf16.mxu1 %v508_v39  ;;  %v128_v3 = vld [vmem:[#allocation6 + $0x150] sm:$0xff]  ;;  %v492_v5 = vpack.c.bf16 %v132_v1, %v129_v63  ;;  %v133_v8 = vld [vmem:[#allocation6 + $0x178] sm:$0xff]  ;;  %v83_v11 = vld [vmem:[#allocation3 + $0x8] sm:$0xff] }
  0x49   :  { %481 = vmatprep.subr.bf16.mxu0 %v480_v40  ;;  %v494_v9 = vpack.c.bf16 %v131_v6, %v128_v3  ;;  %v524_v10 = vpack.c.bf16 %v133_v8, %v130_v7  ;;  %v84_v12 = vld [vmem:[#allocation3 + $0x10] sm:$0xff]  ;;  %v85_v13 = vld [vmem:[#allocation3 + $0x18] sm:$0xff]  ;;  %v347_v17 = vld [vmem:[#allocation8] sm:$0x7] }
  0x4a   :  { %v352_v20 = vrot.slane %v347_v17, %v351_v16  ;;  %v356_v21 = vrot.slane %v347_v17, %v355_v18  ;;  %v360_v23 = vrot.slane %v347_v17, %v359_v19 }
  0x4b   :  { %511 = vmatpush3.bf16.msra.mxu1 %v508_v39 }
  0x4c   :  { %483 = vmatpush1.bf16.msra.mxu0 %v482_v46  ;;  %513 = vmatprep.subr.bf16.mxu1 %v512_v48 }
  0x4d   :  { %485 = vmatprep.subr.bf16.mxu0 %v484_v50 }
  0x4f   :  { %515 = vmatpush3.bf16.msra.mxu1 %v512_v48 }
  0x50   :  { %487 = vmatpush1.bf16.msra.mxu0 %v486_v56  ;;  %517 = vmatprep.subr.bf16.mxu1 %v516_v58 }
  0x51   :  { %489 = vmatprep.subr.bf16.mxu0 %v488_v59 }
  0x53   :  { %519 = vmatpush3.bf16.msra.mxu1 %v516_v58 }
  0x54   :  { %491 = vmatpush1.bf16.msra.mxu0 %v490_v2  ;;  %521 = vmatprep.subr.bf16.mxu1 %v520_v4 }
  0x55   :  { %493 = vmatprep.subr.bf16.mxu0 %v492_v5 }
  0x57   :  { %523 = vmatpush3.bf16.msra.mxu1 %v520_v4 }
  0x58   :  { %495 = vmatpush1.bf16.msra.mxu0 %v494_v9  ;;  %525 = vmatprep.subr.bf16.mxu1 %v524_v10 }
  0x5b   :  { %199 = vmatmul.mubr.f32.vlgmr.msra.gmra.mrb[0].mxu0 %v82_v49  ;;  %527 = vmatpush3.bf16.msra.mxu1 %v524_v10 }
  0x5c   :  { %204 = vmatprep.mubr.f32.mxu0 %v638_v0 }
  0x5e   :  { %459 = vmatmul.mubr.f32.vlgmr.msra.gmra.mrb[0].mxu1 %v83_v11 }
  0x5f   :  { %205 = vmatmul.mubr.f32.gmra.mrb[2].mxu0 %v83_v11  ;;  %461 = vmatprep.mubr.f32.mxu1 %v84_v12 }
  0x60   :  { %210 = vmatprep.mubr.f32.mxu0 %v638_v0 }
  0x62   :  { %462 = vmatmul.mubr.f32.gmra.mrb[2].mxu1 %v85_v13 }
  0x63   :  { %211 = vmatmul.mubr.f32.gmra.mrb[4].mxu0 %v84_v12 }
  0x64   :  { %216 = vmatprep.mubr.f32.mxu0 %v638_v0 }
  0x67   :  { %217 = vmatmul.mubr.f32.gmra.mrb[6].mxu0 %v85_v13 }
 0x12e   :  { %v200_v22 = vpop.f32.mrb[0].mxu0 }
 0x12f   :  { %v364_v24 = vadd.f32 %v352_v20, %v200_v22  ;;  %v202_v25 = vpop.f32.mrb[1].mxu0 }
 0x130   :  { %v365_v26 = vadd.f32 %v356_v21, %v202_v25 }
 0x131   :  { %376 = vst [vmem:[#allocation9] sm:$0xff] %v364_v24  ;;  %v460_v27 = vpop.f32.mrb[0].mxu1 }
 0x132   :  { %377 = vst [vmem:[#allocation9 + $0x8] sm:$0xff] %v365_v26  ;;  %v206_v28 = vpop.f32.mrb[2].mxu0  ;;  %v369_v29 = vadd.f32 %v460_v27, %v360_v23  ;;  %v289_v0 = vpop.f32.mrb[1].mxu1 }
 0x133   :  { %v367_v30 = vadd.f32 %v352_v20, %v206_v28  ;;  %v208_v31 = vpop.f32.mrb[3].mxu0  ;;  %v366_v32 = vadd.f32 %v360_v23, %v289_v0 }
 0x134   :  { %v368_v33 = vadd.f32 %v356_v21, %v208_v31  ;;  %381 = vst [vmem:[#allocation9 + $0x28] sm:$0xff] %v369_v29 }
 0x135   :  { %379 = vst [vmem:[#allocation9 + $0x18] sm:$0xff] %v367_v30  ;;  %378 = vst [vmem:[#allocation9 + $0x10] sm:$0xff] %v366_v32  ;;  %v463_v34 = vpop.f32.mrb[2].mxu1 }
 0x136   :  { %380 = vst [vmem:[#allocation9 + $0x20] sm:$0xff] %v368_v33  ;;  %v212_v35 = vpop.f32.mrb[4].mxu0  ;;  %v375_v36 = vadd.f32 %v463_v34, %v360_v23  ;;  %v299_v37 = vpop.f32.mrb[3].mxu1 }
 0x137   :  { %v370_v38 = vadd.f32 %v352_v20, %v212_v35  ;;  %v214_v39 = vpop.f32.mrb[5].mxu0  ;;  %v372_v40 = vadd.f32 %v360_v23, %v299_v37 }
 0x138   :  { %v371_v41 = vadd.f32 %v356_v21, %v214_v39  ;;  %387 = vst [vmem:[#allocation9 + $0x58] sm:$0xff] %v375_v36 }
 0x139   :  { %382 = vst [vmem:[#allocation9 + $0x30] sm:$0xff] %v370_v38  ;;  %384 = vst [vmem:[#allocation9 + $0x40] sm:$0xff] %v372_v40 }
 0x13a   :  { %383 = vst [vmem:[#allocation9 + $0x38] sm:$0xff] %v371_v41  ;;  %v218_v42 = vpop.f32.mrb[6].mxu0 }
 0x13b   :  { %v373_v43 = vadd.f32 %v352_v20, %v218_v42  ;;  %v220_v44 = vpop.f32.mrb[7].mxu0 }
 0x13c   :  { %v374_v45 = vadd.f32 %v356_v21, %v220_v44 }
 0x13d   :  { %385 = vst [vmem:[#allocation9 + $0x48] sm:$0xff] %v373_v43 }
 0x13e   :  { %386 = vst [vmem:[#allocation9 + $0x50] sm:$0xff] %v374_v45 }
 0x13f   :  { %614 = shalt.err (!%p611_p0)
}
 0x140   :  { %s615_s30 = scalar_lea.hbm %s721_s3, 1536 }
 0x141   :  { %p616_p1 = scmp.ne.s32.totalorder %s721_s3, %s615_s30  ;;  %p619_p2 = scmp.lt.u32.totalorder %s615_s30, %s721_s3 }
 0x143   :  { %p621_p3 = pnand %p619_p2, %p616_p1 }
 0x145   :  { %624 = shalt.err (!%p621_p3)
}
 0x146   :  { %399 = dma.vmem_to_hbm [thread:$0]  %s394_s26, 1536, %s721_s3, [#allocation5], %s632_s22, %s632_s22, %s633_s23  }
 0x147   :  { %629 = dma.done.wait [#allocation5], 1536  }
 0x148   :  { %630 = vsyncadd [#allocation5], 4294965760 }
 0x149   :  { %403 = vsyncpa [#allocation4], 1 }
 0x14a   :  { %404 = vsyncpa [#allocation7], 1 }
 0x14b   :  { %405 = vsyncpa [#allocation5], 1 }

</bundles_post_ra>
